<compile_context>
chip_gen: v7x
topology: tpu7x:2x2x1
jax: 0.10.0
libtpu: 0.0.40
codegen_flags: <defaults>
</compile_context>

<pallas_src>
import math
from functools import partial

import jax
import jax.numpy as jnp
from jax.experimental import pallas as pl
from jax.experimental.pallas import tpu as pltpu

LANE = 128  # TPU lane width; the softmax runs over a 128-lane padded row.


def _round_up(x, m):
    return ((x + m - 1) // m) * m


def _policy_kernel(x_ref, w1_ref, b1_ref, w2_ref, b2_ref, w3_ref, b3_ref,
                   out_ref, *, action_dim):
    # Layer 1: Linear + Tanh  (MXU matmul, f32 accumulation; tanh on EUP).
    h1 = jnp.tanh(
        jnp.dot(x_ref[...], w1_ref[...], preferred_element_type=jnp.float32)
        + b1_ref[...]
    )
    # Layer 2: Linear + Tanh.
    h2 = jnp.tanh(
        jnp.dot(h1.astype(w2_ref.dtype), w2_ref[...],
                preferred_element_type=jnp.float32)
        + b2_ref[...]
    )
    # Layer 3: Linear -> logits, lane-padded to 128 (pad-lane biases = -1e30,
    # so their exp() is exactly 0 and real probabilities are unaffected).
    logits = (
        jnp.dot(h2.astype(w3_ref.dtype), w3_ref[...],
                preferred_element_type=jnp.float32)
        + b3_ref[...]
    )
    # Numerically stable softmax over the full 128-lane row.
    m = jnp.max(logits, axis=-1, keepdims=True)
    e = jnp.exp(logits - m)
    inv = pl.reciprocal(jnp.sum(e, axis=-1, keepdims=True), approx=True)
    # Store only the real action columns -> narrow HBM writeback.
    out_ref[...] = (e[:, :action_dim] * inv).astype(out_ref.dtype)


@partial(jax.jit, static_argnames=("tb", "compute_dtype"))
def policy_net_probs(state, params, *, tb=2048, compute_dtype=jnp.bfloat16):
    """Fused PolicyNet forward pass. Returns Categorical probs (batch, action_dim).

    tb: max batch-tile (rows per grid step); the actual tile is shrunk so the
        grid has an even number of steps (>=2 when the batch allows), keeping
        both v7x TensorCores busy and ragged-batch padding minimal.
    compute_dtype: dtype fed to the MXU (bf16 default on all generations);
        bias add / tanh / softmax and accumulation stay float32.
    """
    w1, b1, w2, b2, w3, b3 = params
    batch, state_dim = state.shape
    hidden = w1.shape[1]
    action_dim = w3.shape[1]

    # Lane-dense last layer: pad out to a multiple of 128 lanes for the
    # softmax reductions.  Pad-column biases are a large negative constant so
    # exp() of padded lanes is exactly 0.
    p_out = _round_up(action_dim, LANE)
    w3p = jnp.pad(w3, ((0, 0), (0, p_out - action_dim)))
    b3p = jnp.pad(b3, ((0, 0), (0, p_out - action_dim)), constant_values=-1e30)

    # Batch tiling: even number of grid steps (>=2 when possible), sublane
    # aligned, with minimal padded rows for ragged batches.
    batch8 = _round_up(batch, 8)
    n_steps = max(2, pl.cdiv(batch8, tb))
    if n_steps % 2:
        n_steps += 1
    tb_eff = _round_up(pl.cdiv(batch8, n_steps), 8)
    padded_batch = _round_up(batch, tb_eff)
    if padded_batch != batch:
        state = jnp.pad(state, ((0, padded_batch - batch), (0, 0)))

    # Low-precision MXU inputs; biases stay f32 for the f32 epilogue.
    state_c = state.astype(compute_dtype)
    w1c = w1.astype(compute_dtype)
    w2c = w2.astype(compute_dtype)
    w3c = w3p.astype(compute_dtype)

    grid = (padded_batch // tb_eff,)

    out = pl.pallas_call(
        partial(_policy_kernel, action_dim=action_dim),
        out_shape=jax.ShapeDtypeStruct((padded_batch, action_dim), jnp.float32),
        grid=grid,
        in_specs=[
            # state: tiled along the batch axis (pipelined HBM<->VMEM).
            pl.BlockSpec((tb_eff, state_dim), lambda i: (i, 0)),
            # weights / biases: constant index_map -> VMEM-resident, no re-DMA.
            pl.BlockSpec((state_dim, hidden), lambda i: (0, 0)),
            pl.BlockSpec((1, hidden), lambda i: (0, 0)),
            pl.BlockSpec((hidden, hidden), lambda i: (0, 0)),
            pl.BlockSpec((1, hidden), lambda i: (0, 0)),
            pl.BlockSpec((hidden, p_out), lambda i: (0, 0)),
            pl.BlockSpec((1, p_out), lambda i: (0, 0)),
        ],
        # Narrow (action_dim-wide) output: ~32x less HBM writeback than the
        # old 128-lane padded f32 slab, and no wrapper column re-slice.
        out_specs=pl.BlockSpec((tb_eff, action_dim), lambda i: (i, 0)),
        compiler_params=pltpu.CompilerParams(
            dimension_semantics=("parallel",),  # shards batch over v7x's 2 TCs
        ),
    )(state_c, w1c, b1, w2c, b2, w3c, b3p)

    if padded_batch != batch:
        out = out[:batch]
    return out


def init_policy_params(key, state_dim, action_dim, hidden_size=64):
    """Deterministic init mimicking PyTorch nn.Linear default (uniform +-1/sqrt(fan_in)).

    Weights are stored transposed: (in_features, out_features).
    Biases are stored as (1, out_features) for clean 2-D broadcasting in-kernel.
    """
    def linear(k, fan_in, fan_out):
        kw, kb = jax.random.split(k)
        bound = 1.0 / math.sqrt(fan_in)
        w = jax.random.uniform(kw, (fan_in, fan_out), jnp.float32, -bound, bound)
        b = jax.random.uniform(kb, (1, fan_out), jnp.float32, -bound, bound)
        return w, b

    k1, k2, k3 = jax.random.split(key, 3)
    w1, b1 = linear(k1, state_dim, hidden_size)
    w2, b2 = linear(k2, hidden_size, hidden_size)
    w3, b3 = linear(k3, hidden_size, action_dim)
    return (w1, b1, w2, b2, w3, b3)


def _reference_probs(state, params, compute_dtype=jnp.float32):
    """Pure-JAX reference mirroring the kernel's MXU input precision."""
    w1, b1, w2, b2, w3, b3 = params

    def lp(a):  # round matmul inputs the way the kernel does, math in f32
        return a.astype(compute_dtype).astype(jnp.float32)

    h1 = jnp.tanh(lp(state) @ lp(w1) + b1)
    h2 = jnp.tanh(lp(h1) @ lp(w2) + b2)
    logits = lp(h2) @ lp(w3) + b3
    return jax.nn.softmax(logits, axis=-1)


if __name__ == "__main__":
    # Note: at batch=2 this is pure launch latency; the kernel pays off once
    # the batch grid is actually exercised (many rollout states per call).
    batch = 2
    state_dim = 8
    action_dim = 4
    hidden_size = 64  # module default

    key = jax.random.PRNGKey(0)
    k_params, k_state = jax.random.split(key)

    params = init_policy_params(k_params, state_dim, action_dim, hidden_size)
    state = jax.random.normal(k_state, (batch, state_dim), dtype=jnp.float32)

    # Default path: bf16 MXU inputs, f32 accumulation/epilogue.
    probs = jax.block_until_ready(policy_net_probs(state, params))
    ref_bf16 = _reference_probs(state, params, compute_dtype=jnp.bfloat16)
    assert probs.shape == (batch, action_dim)
    # approx reciprocal (EUP) + bf16 MXU inputs => modest tolerance
    assert jnp.allclose(probs, ref_bf16, atol=5e-3, rtol=5e-3)
    assert jnp.allclose(jnp.sum(probs, axis=-1), 1.0, atol=5e-3)

    # Full-f32 path for a tighter numerical check of the kernel math.
    probs_f32 = jax.block_until_ready(
        policy_net_probs(state, params, compute_dtype=jnp.float32))
    ref_f32 = _reference_probs(state, params)
    assert jnp.allclose(probs_f32, ref_f32, atol=2e-3, rtol=2e-3)

    # Exercise the multi-step batch grid path (ragged batch -> 2 even tiles).
    big_state = jax.random.normal(jax.random.PRNGKey(1), (1037, state_dim),
                                  dtype=jnp.float32)
    big_probs = jax.block_until_ready(policy_net_probs(big_state, params))
    big_ref = _reference_probs(big_state, params, compute_dtype=jnp.bfloat16)
    assert big_probs.shape == (1037, action_dim)
    assert jnp.allclose(big_probs, big_ref, atol=5e-3, rtol=5e-3)

    print("KERNEL_OK")
</pallas_src>

<mosaic_0001>
module attributes {stable_mosaic.version = 11 : i64} {
  func.func @_policy_kernel(%arg0: i32, %arg1: memref<8x8xbf16, #tpu.memory_space<vmem>>, %arg2: memref<8x64xbf16, #tpu.memory_space<vmem>>, %arg3: memref<1x64xf32, #tpu.memory_space<vmem>>, %arg4: memref<64x64xbf16, #tpu.memory_space<vmem>>, %arg5: memref<1x64xf32, #tpu.memory_space<vmem>>, %arg6: memref<64x128xbf16, #tpu.memory_space<vmem>>, %arg7: memref<1x128xf32, #tpu.memory_space<vmem>>, %arg8: memref<8x4xf32, #tpu.memory_space<vmem>>) attributes {dimension_semantics = [#tpu.dimension_semantics<parallel>], iteration_bounds = array<i64: 1>, scalar_prefetch = 0 : i64, scratch_operands = 0 : i64, tpu.core_type = #tpu.core_type<tc>, window_params = [{transform_indices = @transform_0, window_bounds = array<i64: 8, 8>}, {pipeline_mode = #tpu.pipeline_mode<synchronous>, transform_indices = @transform_1, window_bounds = array<i64: 8, 64>}, {pipeline_mode = #tpu.pipeline_mode<synchronous>, transform_indices = @transform_2, window_bounds = array<i64: 1, 64>}, {pipeline_mode = #tpu.pipeline_mode<synchronous>, transform_indices = @transform_3, window_bounds = array<i64: 64, 64>}, {pipeline_mode = #tpu.pipeline_mode<synchronous>, transform_indices = @transform_4, window_bounds = array<i64: 1, 64>}, {pipeline_mode = #tpu.pipeline_mode<synchronous>, transform_indices = @transform_5, window_bounds = array<i64: 64, 128>}, {pipeline_mode = #tpu.pipeline_mode<synchronous>, transform_indices = @transform_6, window_bounds = array<i64: 1, 128>}, {transform_indices = @transform_7, window_bounds = array<i64: 8, 4>}]} {
    %c0 = arith.constant 0 : index
    %c0_0 = arith.constant 0 : index
    %0 = vector.load %arg1[%c0, %c0_0] : memref<8x8xbf16, #tpu.memory_space<vmem>>, vector<8x8xbf16>
    %c0_1 = arith.constant 0 : index
    %c0_2 = arith.constant 0 : index
    %1 = vector.load %arg2[%c0_1, %c0_2] : memref<8x64xbf16, #tpu.memory_space<vmem>>, vector<8x64xbf16>
    %cst = arith.constant dense<0.000000e+00> : vector<8x64xf32>
    %2 = tpu.matmul %0, %1, %cst {dimension_numbers = #tpu.dot_dimension_numbers<[1], [0], [0], [1], [0, 0, 1, 1], [], []>} : vector<8x8xbf16>, vector<8x64xbf16>, vector<8x64xf32> -> vector<8x64xf32>
    %c0_3 = arith.constant 0 : index
    %c0_4 = arith.constant 0 : index
    %3 = vector.load %arg3[%c0_3, %c0_4] : memref<1x64xf32, #tpu.memory_space<vmem>>, vector<1x64xf32>
    %4 = vector.broadcast %3 : vector<1x64xf32> to vector<8x64xf32>
    %5 = arith.addf %2, %4 : vector<8x64xf32>
    %6 = math.tanh %5 : vector<8x64xf32>
    %7 = arith.truncf %6 : vector<8x64xf32> to vector<8x64xbf16>
    %c0_5 = arith.constant 0 : index
    %c0_6 = arith.constant 0 : index
    %8 = vector.load %arg4[%c0_5, %c0_6] : memref<64x64xbf16, #tpu.memory_space<vmem>>, vector<64x64xbf16>
    %cst_7 = arith.constant dense<0.000000e+00> : vector<8x64xf32>
    %9 = tpu.matmul %7, %8, %cst_7 {dimension_numbers = #tpu.dot_dimension_numbers<[1], [0], [0], [1], [0, 0, 1, 1], [], []>} : vector<8x64xbf16>, vector<64x64xbf16>, vector<8x64xf32> -> vector<8x64xf32>
    %c0_8 = arith.constant 0 : index
    %c0_9 = arith.constant 0 : index
    %10 = vector.load %arg5[%c0_8, %c0_9] : memref<1x64xf32, #tpu.memory_space<vmem>>, vector<1x64xf32>
    %11 = vector.broadcast %10 : vector<1x64xf32> to vector<8x64xf32>
    %12 = arith.addf %9, %11 : vector<8x64xf32>
    %13 = math.tanh %12 : vector<8x64xf32>
    %14 = arith.truncf %13 : vector<8x64xf32> to vector<8x64xbf16>
    %c0_10 = arith.constant 0 : index
    %c0_11 = arith.constant 0 : index
    %15 = vector.load %arg6[%c0_10, %c0_11] : memref<64x128xbf16, #tpu.memory_space<vmem>>, vector<64x128xbf16>
    %cst_12 = arith.constant dense<0.000000e+00> : vector<8x128xf32>
    %16 = tpu.matmul %14, %15, %cst_12 {dimension_numbers = #tpu.dot_dimension_numbers<[1], [0], [0], [1], [0, 0, 1, 1], [], []>} : vector<8x64xbf16>, vector<64x128xbf16>, vector<8x128xf32> -> vector<8x128xf32>
    %c0_13 = arith.constant 0 : index
    %c0_14 = arith.constant 0 : index
    %17 = vector.load %arg7[%c0_13, %c0_14] : memref<1x128xf32, #tpu.memory_space<vmem>>, vector<1x128xf32>
    %18 = vector.broadcast %17 : vector<1x128xf32> to vector<8x128xf32>
    %19 = arith.addf %16, %18 : vector<8x128xf32>
    %cst_15 = arith.constant dense<0xFF800000> : vector<8xf32>
    %20 = vector.multi_reduction <maximumf>, %19, %cst_15 [1] : vector<8x128xf32> to vector<8xf32>
    %21 = vector.shape_cast %20 : vector<8xf32> to vector<8x1xf32>
    %22 = vector.broadcast %21 : vector<8x1xf32> to vector<8x128xf32>
    %23 = arith.subf %19, %22 : vector<8x128xf32>
    %24 = math.exp %23 : vector<8x128xf32>
    %cst_16 = arith.constant dense<0.000000e+00> : vector<8xf32>
    %25 = vector.multi_reduction <add>, %24, %cst_16 [1] : vector<8x128xf32> to vector<8xf32>
    %26 = vector.shape_cast %25 : vector<8xf32> to vector<8x1xf32>
    %27 = tpu.reciprocal %26 {approx = true} : vector<8x1xf32> -> vector<8x1xf32>
    %28 = vector.extract_strided_slice %24 {offsets = [0, 0], sizes = [8, 4], strides = [1, 1]} : vector<8x128xf32> to vector<8x4xf32>
    %29 = vector.broadcast %27 : vector<8x1xf32> to vector<8x4xf32>
    %30 = arith.mulf %28, %29 : vector<8x4xf32>
    %c0_17 = arith.constant 0 : index
    %c0_18 = arith.constant 0 : index
    %31 = vector.load %arg8[%c0_17, %c0_18] : memref<8x4xf32, #tpu.memory_space<vmem>>, vector<8x4xf32>
    tpu.vector_store %arg8[%c0_17, %c0_18], %30 {strides = array<i32>} : memref<8x4xf32, #tpu.memory_space<vmem>>, vector<8x4xf32>,
    return
  }
  func.func @transform_0(%arg0: i32) -> (i32, i32) {
    %c0_i32 = arith.constant 0 : i32
    %c0_i32_0 = arith.constant 0 : i32
    return %arg0, %c0_i32 : i32, i32
  }
  func.func @transform_1(%arg0: i32) -> (i32, i32) {
    %c0_i32 = arith.constant 0 : i32
    %c0_i32_0 = arith.constant 0 : i32
    %c0_i32_1 = arith.constant 0 : i32
    return %c0_i32, %c0_i32_0 : i32, i32
  }
  func.func @transform_2(%arg0: i32) -> (i32, i32) {
    %c0_i32 = arith.constant 0 : i32
    %c0_i32_0 = arith.constant 0 : i32
    %c0_i32_1 = arith.constant 0 : i32
    return %c0_i32, %c0_i32_0 : i32, i32
  }
  func.func @transform_3(%arg0: i32) -> (i32, i32) {
    %c0_i32 = arith.constant 0 : i32
    %c0_i32_0 = arith.constant 0 : i32
    %c0_i32_1 = arith.constant 0 : i32
    return %c0_i32, %c0_i32_0 : i32, i32
  }
  func.func @transform_4(%arg0: i32) -> (i32, i32) {
    %c0_i32 = arith.constant 0 : i32
    %c0_i32_0 = arith.constant 0 : i32
    %c0_i32_1 = arith.constant 0 : i32
    return %c0_i32, %c0_i32_0 : i32, i32
  }
  func.func @transform_5(%arg0: i32) -> (i32, i32) {
    %c0_i32 = arith.constant 0 : i32
    %c0_i32_0 = arith.constant 0 : i32
    %c0_i32_1 = arith.constant 0 : i32
    return %c0_i32, %c0_i32_0 : i32, i32
  }
  func.func @transform_6(%arg0: i32) -> (i32, i32) {
    %c0_i32 = arith.constant 0 : i32
    %c0_i32_0 = arith.constant 0 : i32
    %c0_i32_1 = arith.constant 0 : i32
    return %c0_i32, %c0_i32_0 : i32, i32
  }
  func.func @transform_7(%arg0: i32) -> (i32, i32) {
    %c0_i32 = arith.constant 0 : i32
    %c0_i32_0 = arith.constant 0 : i32
    return %arg0, %c0_i32 : i32, i32
  }
}

</mosaic_0001>

<bundles_post_ra>
// kernel: policy_net_probs.1
= control target key start
LH: loop header
LB: loop body
LE: loop exit
PB: predicated region body
PF: predicated region fallthrough
CT: control target
= control target key end

     0   :  { %vm40_vm0 = vcmask 1043456   ;;  %v342_v0 = vmov 0.0   ;;  %vm343_vm1 = vmmov 0   ;;  %vm36_vm2 = vcmask 64512   ;;  %s428_s1 = inlined_call_operand.vmem [shape: bf16[8,64], index: 1, kind: input, shape index: {}]   ;;  %s429_s0 = inlined_call_operand.vmem [shape: bf16[8,8], index: 0, kind: input, shape index: {}]   ;;  %s430_s3 = inlined_call_operand.vmem [shape: bf16[64,64], index: 3, kind: input, shape index: {}]   ;;  %s431_s2 = inlined_call_operand.vmem [shape: f32[1,64], index: 2, kind: input, shape index: {}]   ;;  %s432_s5 = inlined_call_operand.vmem [shape: bf16[64,128], index: 5, kind: input, shape index: {}]   ;;  %s433_s4 = inlined_call_operand.vmem [shape: f32[1,64], index: 4, kind: input, shape index: {}]   ;;  %s434_s6 = inlined_call_operand.vmem [shape: f32[1,128], index: 6, kind: input, shape index: {}]   ;;  %s435_s7 = inlined_call_operand.vmem [shape: f32[8,4], index: 7, kind: output, shape index: {}]  }
   0x1   :  { %294 = vmatprep.subr.bf16.mxu0 %v342_v0  ;;  %v28_v1 = vld [vmem:[%s428_s1] sm:$0xf]  ;;  %296 = vmatprep.mubr.msk.bf16.mxu0 %vm343_vm1, %v342_v0  ;;  %v327_v5 = vld [vmem:[%s430_s3 + $0x8] sm:$0xff]   ;;  %v328_v6 = vld [vmem:[%s430_s3 + $0x10] sm:$0xff]   ;;  %vm125_vm3 = vcmask 523264   ;;  %vm262_vm4 = vcmask 31744  }
   0x2   :  { %v42_v2 = vsel %vm40_vm0, %v28_v1, 0  ;;  %300 = vmatprep.subr.bf16.mxu1 %v342_v0  ;;  %308 = vmatprep.mubr.msk.bf16.mxu1 %vm343_vm1, %v342_v0  ;;  %v27_v3 = vld [vmem:[%s429_s0] sm:$0xf]  ;;  %v329_v7 = vld [vmem:[%s430_s3 + $0x18] sm:$0xff]   ;;  %v331_v17 = vld [vmem:[%s432_s5 + $0x8] sm:$0xff]  }
   0x3   :  { %295 = vmatpush3.bf16.msra.mxu0 %v42_v2  ;;  %v326_v4 = vld [vmem:[%s430_s3] sm:$0xff]   ;;  %v332_v18 = vld [vmem:[%s432_s5 + $0x10] sm:$0xff]   ;;  %v333_v19 = vld [vmem:[%s432_s5 + $0x18] sm:$0xff]  }
   0x4   :  { %312 = vmatprep.subr.bf16.mxu0 %v342_v0  ;;  %301 = vmatpush3.bf16.msra.mxu1 %v326_v4  ;;  %v268_v8 = vld [vmem:[%s431_s2] ss:$0 sm:$0xff] }
   0x5   :  { %302 = vmatprep.subr.bf16.mxu1 %v342_v0  ;;  %v330_v16 = vld [vmem:[%s432_s5] sm:$0xff]  }
   0x6   :  { %297 = vmatmul.mubr.msk.bf16.vlgmr.msra.gmra.mrb[0].mxu0 %vm36_vm2, %v27_v3  ;;  %v270_v20 = vld [vmem:[%s433_s4] ss:$0 sm:$0xff] }
   0x7   :  { %320 = vmatprep.mubr.msk.bf16.mxu0 %vm343_vm1, %v342_v0  ;;  %313 = vmatpush3.bf16.msra.mxu0 %v330_v16  ;;  %v276_v28 = vld [vmem:[%s434_s6] ss:$0 sm:$0xff] }
   0x8   :  { %303 = vmatpush3.bf16.msra.mxu1 %v327_v5  ;;  %314 = vmatprep.subr.bf16.mxu0 %v342_v0 }
   0x9   :  { %304 = vmatprep.subr.bf16.mxu1 %v342_v0 }
   0xb   :  { %315 = vmatpush3.bf16.msra.mxu0 %v331_v17 }
   0xc   :  { %305 = vmatpush3.bf16.msra.mxu1 %v328_v6  ;;  %316 = vmatprep.subr.bf16.mxu0 %v342_v0 }
   0xd   :  { %306 = vmatprep.subr.bf16.mxu1 %v342_v0 }
   0xf   :  { %317 = vmatpush3.bf16.msra.mxu0 %v332_v18 }
  0x10   :  { %307 = vmatpush3.bf16.msra.mxu1 %v329_v7  ;;  %318 = vmatprep.subr.bf16.mxu0 %v342_v0 }
  0x13   :  { %319 = vmatpush3.bf16.msra.mxu0 %v333_v19 }
  0xd9   :  { %v78_v9 = vpop.f32.mrb[0].mxu0 }
  0xda   :  { %v79_v10 = vadd.f32 %v268_v8, %v78_v9  ;;  %v298_v11 = vpop.f32.mrb[1].mxu0 }
  0xdb   :  { %v81_v12 = vpop.f32.mrb[2].mxu0 }
  0xdc   :  { %334 = vtanh.f32 %v79_v10  ;;  %v299_v13 = vpop.f32.mrb[3].mxu0 }
  0xe6   :  { %v335_v14 = vpop.eup %334 }
  0xe7   :  { %v85_v15 = vpack.c.bf16 %v335_v14, %v335_v14 }
  0xe9   :  { %309 = vmatmul.mubr.msk.bf16.vlgmr.msra.gmra.mrb[0].mxu1 %vm125_vm3, %v85_v15 }
 0x1bc   :  { %v163_v21 = vpop.f32.mrb[0].mxu1 }
 0x1bd   :  { %v164_v22 = vadd.f32 %v270_v20, %v163_v21  ;;  %v310_v23 = vpop.f32.mrb[1].mxu1 }
 0x1be   :  { %v166_v24 = vpop.f32.mrb[2].mxu1 }
 0x1bf   :  { %336 = vtanh.f32 %v164_v22  ;;  %v311_v25 = vpop.f32.mrb[3].mxu1 }
 0x1c9   :  { %v337_v26 = vpop.eup %336 }
 0x1ca   :  { %v170_v27 = vpack.c.bf16 %v337_v26, %v337_v26 }
 0x1cc   :  { %321 = vmatmul.mubr.msk.bf16.vlgmr.msra.gmra.mrb[4].mxu0 %vm125_vm3, %v170_v27 }
 0x29f   :  { %v247_v29 = vpop.f32.mrb[4].mxu0 }
 0x2a0   :  { %v248_v30 = vadd.f32 %v276_v28, %v247_v29  ;;  %v322_v31 = vpop.f32.mrb[5].mxu0 }
 0x2a1   :  { %v250_v32 = vpop.f32.mrb[6].mxu0 }
 0x2a2   :  { %253 = vmax.xlane.f32.xlu0 %v248_v30  ;;  %v323_v33 = vpop.f32.mrb[7].mxu0 }
 0x32f   :  { %v254_v34 = vpop.xlane.xlu0 %253 }
 0x330   :  { %v255_v35 = vsub.f32 %v248_v30, %v254_v34 }
 0x332   :  { %v256_v36 = vmul.f32 1.442695, %v255_v35 }
 0x334   :  { %338 = vpow2.f32 %v256_v36 }
 0x33e   :  { %v339_v37 = vpop.eup %338 }
 0x33f   :  { %258 = vadd.xlane.f32.xlu0 %v339_v37 }
 0x3cc   :  { %v259_v38 = vpop.xlane.xlu0 %258 }
 0x3cd   :  { %340 = vrcp.f32 %v259_v38 }
 0x3d7   :  { %v341_v39 = vpop.eup %340 }
 0x3d8   :  { %v261_v40 = vmul.f32 %v341_v39, %v339_v37 }
 0x3da   :  { %263 = vst.msk [vmem:[%s435_s7] sm:$0xff] %vm262_vm4, %v261_v40 }

</bundles_post_ra>
